<compile_context>
chip_gen: v5e
topology: v5e:2x2
jax: 0.10.0
libtpu: 0.0.40
codegen_flags: <defaults>
</compile_context>

<pallas_src>
import functools

import jax
import jax.numpy as jnp
from jax.experimental import pallas as pl
from jax.experimental.pallas import tpu as pltpu

LEAKY_SLOPE = 0.01
BN_EPS = 1e-5
LANE = 128
SUBLANE = 8


def _round_up(x, m):
    return (x + m - 1) // m * m


# ----------------------------- Pallas kernels ------------------------------ #

def _conv_block_kernel(p_ref, w_ref, shift_ref, o_ref, *, taps, rows):
    """Fused circular 3x3/stride-2 conv + folded-BN affine + LeakyReLU.

    p_ref     : (1, 4, mrows, Cin)  space-to-depth phases, spatially flattened
    w_ref     : (9, Cin, 128)       BN-scale-folded weights (one Cout lane tile)
    shift_ref : (1, 128)            folded bias/BN shift
    o_ref     : (1, rows, 128)      output rows (Ho*Wp padded to 8)
    """
    # Register-held accumulation over the 9 taps (no VMEM RMW per tap).
    phase0, off0 = taps[0]
    acc = jnp.dot(p_ref[0, phase0, off0:off0 + rows, :], w_ref[0],
                  preferred_element_type=jnp.float32)
    for t, (phase, off) in enumerate(taps[1:], start=1):
        tap = p_ref[0, phase, off:off + rows, :]            # (rows, Cin)
        acc = acc + jnp.dot(tap, w_ref[t],
                            preferred_element_type=jnp.float32)
    z = acc + shift_ref[...]
    o_ref[0] = jnp.where(z >= 0, z, LEAKY_SLOPE * z)


def _linear_kernel(x_ref, w_ref, b_ref, o_ref):
    acc = jnp.dot(x_ref[...], w_ref[...], preferred_element_type=jnp.float32)
    o_ref[...] = acc + b_ref[...]


# ------------------------------ Conv block ---------------------------------- #

def _space_to_depth_phases(x_nhwc, mrows):
    """Circular pad=1, 2x2 space-to-depth, flatten (i,j) -> i*Wp+j, pad rows."""
    N, H, W, C = x_nhwc.shape
    Hp, Wp = H // 2 + 1, W // 2 + 1
    xp = jnp.pad(x_nhwc, ((0, 0), (1, 1), (1, 1), (0, 0)), mode="wrap")
    p6 = xp.reshape(N, Hp, 2, Wp, 2, C).transpose(0, 2, 4, 1, 3, 5)
    pf = p6.reshape(N, 4, Hp * Wp, C)                       # phase = 2*py + px
    return jnp.pad(pf, ((0, 0), (0, 0), (0, mrows - Hp * Wp), (0, 0)))


def _conv_block(x_nhwc, blk):
    N, H, W, C = x_nhwc.shape
    assert H % 2 == 0 and W % 2 == 0, "downsampling requires even spatial dims"
    Ho, Wo = H // 2, W // 2
    Wp = Wo + 1
    cout = blk["cout"]
    cout_pad = blk["w_taps"].shape[-1]
    n_ct = cout_pad // LANE

    rows = _round_up(Ho * Wp, SUBLANE)           # output rows per sample
    mrows = _round_up(rows + Wp + 2, SUBLANE)    # phase rows per sample (>= Hp*Wp)
    phases = _space_to_depth_phases(x_nhwc, mrows)

    # tap (dy, dx): phase = 2*(dy%2) + (dx%2), flat row offset = (dy//2)*Wp + dx//2
    taps = tuple((2 * (dy % 2) + (dx % 2), (dy // 2) * Wp + (dx // 2))
                 for dy in range(3) for dx in range(3))
    kernel = functools.partial(_conv_block_kernel, taps=taps, rows=rows)

    flops = 2 * 9 * N * rows * C * cout_pad
    bytes_accessed = 4 * (phases.size + blk["w_taps"].size + blk["shift"].size
                          + N * rows * cout_pad)

    out = pl.pallas_call(
        kernel,
        out_shape=jax.ShapeDtypeStruct((N, rows, cout_pad), jnp.float32),
        grid=(N, n_ct),
        in_specs=[
            pl.BlockSpec((1, 4, mrows, C), lambda n, j: (n, 0, 0, 0)),
            pl.BlockSpec((9, C, LANE), lambda n, j: (0, 0, j)),
            pl.BlockSpec((1, LANE), lambda n, j: (0, j)),
        ],
        out_specs=pl.BlockSpec((1, rows, LANE), lambda n, j: (n, 0, j)),
        compiler_params=pltpu.CompilerParams(
            dimension_semantics=("parallel", "parallel"),
            vmem_limit_bytes=64 * 1024 * 1024),
        cost_estimate=pl.CostEstimate(flops=flops, transcendentals=0,
                                      bytes_accessed=bytes_accessed),
    )(phases, blk["w_taps"], blk["shift"])

    # drop padded rows / garbage column / padded lanes -> (N, Ho, Wo, Cout) NHWC
    y = out[:, :Ho * Wp, :cout].reshape(N, Ho, Wp, cout)[:, :, :Wo, :]
    return y


# ------------------------------- Linear head -------------------------------- #

def _linear(flat, w_pad, b_pad, n_out):
    M, K = flat.shape
    m_pad = _round_up(M, SUBLANE)
    n_pad = w_pad.shape[1]
    x_p = jnp.pad(flat, ((0, m_pad - M), (0, 0)))
    out = pl.pallas_call(
        _linear_kernel,
        out_shape=jax.ShapeDtypeStruct((m_pad, n_pad), jnp.float32),
        grid=(1,),
        in_specs=[
            pl.BlockSpec((m_pad, K), lambda i: (0, 0)),
            pl.BlockSpec((K, n_pad), lambda i: (0, 0)),
            pl.BlockSpec((1, n_pad), lambda i: (0, 0)),
        ],
        out_specs=pl.BlockSpec((m_pad, n_pad), lambda i: (0, 0)),
        compiler_params=pltpu.CompilerParams(
            dimension_semantics=("arbitrary",),
            vmem_limit_bytes=64 * 1024 * 1024),
        cost_estimate=pl.CostEstimate(
            flops=2 * m_pad * K * n_pad, transcendentals=0,
            bytes_accessed=4 * (m_pad * K + K * n_pad + n_pad + m_pad * n_pad)),
    )(x_p, w_pad, b_pad)
    return out[:M, :n_out]


# ------------------------------ Model forward ------------------------------ #

def downsampling_forward(x_nchw, params, flatten=True):
    """Equivalent of downsampling.forward (eval-mode BatchNorm)."""
    x = jnp.transpose(x_nchw, (0, 2, 3, 1))  # NCHW -> NHWC
    for blk in params["conv_blocks"]:
        x = _conv_block(x, blk)
    if not flatten:
        return jnp.transpose(x, (0, 3, 1, 2))
    # PyTorch flattens the NCHW tensor -> keep (C, H, W) ordering.
    flat = jnp.transpose(x, (0, 3, 1, 2)).reshape(x.shape[0], -1)
    return _linear(flat, params["fc_w_pad"], params["fc_b_pad"], params["n_out"])


# ------------------------- Deterministic parameters ------------------------ #

def init_params(key, n_down, n_in, n_out, nx, hidden_dims, flatten=True):
    params = {"conv_blocks": [], "n_out": n_out}
    for i in range(n_down):
        nin = n_in if i == 0 else hidden_dims[i - 1]
        nout = n_out if (i == n_down - 1 and not flatten) else hidden_dims[i]
        key, k1, k2, k3, k4, k5, k6 = jax.random.split(key, 7)
        w = jax.random.normal(k1, (nout, nin, 3, 3), jnp.float32) / jnp.sqrt(9.0 * nin)
        b = 0.1 * jax.random.normal(k2, (nout,), jnp.float32)
        gamma = 1.0 + 0.1 * jax.random.normal(k3, (nout,), jnp.float32)
        beta = 0.1 * jax.random.normal(k4, (nout,), jnp.float32)
        mean = 0.1 * jax.random.normal(k5, (nout,), jnp.float32)
        var = 1.0 + 0.1 * jnp.abs(jax.random.normal(k6, (nout,), jnp.float32))
        s = gamma / jnp.sqrt(var + BN_EPS)

        cout_pad = _round_up(nout, LANE)
        # OIHW -> (dy,dx,Cin,Cout) -> (9, Cin, Cout); fold BN scale; pad lanes.
        w_taps = jnp.transpose(w, (2, 3, 1, 0)).reshape(9, nin, nout) * s[None, None, :]
        w_taps = jnp.pad(w_taps, ((0, 0), (0, 0), (0, cout_pad - nout)))
        shift = jnp.pad((b - mean) * s + beta, (0, cout_pad - nout))[None, :]

        params["conv_blocks"].append({
            "w_oihw": w, "b": b, "gamma": gamma, "beta": beta,
            "mean": mean, "var": var,
            "w_taps": w_taps, "shift": shift, "cout": nout,
        })
    if flatten:
        in_feat = hidden_dims[n_down - 1] * (nx // 2 ** n_down) ** 2
        key, kw, kb = jax.random.split(key, 3)
        fc_w = jax.random.normal(kw, (n_out, in_feat), jnp.float32) / jnp.sqrt(float(in_feat))
        fc_b = 0.1 * jax.random.normal(kb, (n_out,), jnp.float32)
        n_pad = _round_up(n_out, LANE)
        params["fc_w"] = fc_w
        params["fc_b"] = fc_b
        params["fc_w_pad"] = jnp.pad(fc_w.T, ((0, 0), (0, n_pad - n_out)))  # done once at init
        params["fc_b_pad"] = jnp.pad(fc_b, (0, n_pad - n_out))[None, :]
    return params


# ------------------------------ Pure-JAX reference -------------------------- #

def reference_forward(x_nchw, params, flatten=True):
    x = jnp.transpose(x_nchw, (0, 2, 3, 1))
    for blk in params["conv_blocks"]:
        xp = jnp.pad(x, ((0, 0), (1, 1), (1, 1), (0, 0)), mode="wrap")
        w_hwio = jnp.transpose(blk["w_oihw"], (2, 3, 1, 0))
        y = jax.lax.conv_general_dilated(
            xp, w_hwio, window_strides=(2, 2), padding="VALID",
            dimension_numbers=("NHWC", "HWIO", "NHWC"))
        y = y + blk["b"]
        y = (y - blk["mean"]) / jnp.sqrt(blk["var"] + BN_EPS) * blk["gamma"] + blk["beta"]
        x = jnp.where(y >= 0, y, LEAKY_SLOPE * y)
    if not flatten:
        return jnp.transpose(x, (0, 3, 1, 2))
    flat = jnp.transpose(x, (0, 3, 1, 2)).reshape(x.shape[0], -1)
    return flat @ params["fc_w"].T + params["fc_b"]


# ----------------------------------- main ----------------------------------- #

if __name__ == "__main__":
    # Small config: n_down=2, n_in=4, n_out=3, nx=16, hidden_dims=[8, 16]
    n_down, n_in, n_out, nx = 2, 4, 3, 16
    hidden_dims = [8, 16, 32, 64, 128, 256]
    batch = 2

    key = jax.random.PRNGKey(0)
    key, kx, kp = jax.random.split(key, 3)
    x = jax.random.normal(kx, (batch, n_in, nx, nx), jnp.float32)  # NCHW like PyTorch
    params = init_params(kp, n_down, n_in, n_out, nx, hidden_dims, flatten=True)

    out = downsampling_forward(x, params, flatten=True)
    out = jax.block_until_ready(out)

    ref = jax.block_until_ready(reference_forward(x, params, flatten=True))
    assert out.shape == (batch, n_out), out.shape
    assert jnp.allclose(out, ref, rtol=1e-4, atol=1e-4), float(jnp.max(jnp.abs(out - ref)))

    print("KERNEL_OK")
</pallas_src>

<mosaic_0001>
module attributes {stable_mosaic.version = 11 : i64} {
  func.func @_conv_block_kernel(%arg0: i32, %arg1: i32, %arg2: memref<1x4x88x4xf32, #tpu.memory_space<vmem>>, %arg3: memref<9x4x128xf32, #tpu.memory_space<vmem>>, %arg4: memref<1x128xf32, #tpu.memory_space<vmem>>, %arg5: memref<1x72x128xf32, #tpu.memory_space<vmem>>) attributes {dimension_semantics = [#tpu.dimension_semantics<parallel>, #tpu.dimension_semantics<parallel>], iteration_bounds = array<i64: 2, 1>, scalar_prefetch = 0 : i64, scratch_operands = 0 : i64, tpu.core_type = #tpu.core_type<tc>, window_params = [{transform_indices = @transform_0, window_bounds = array<i64: 1, 4, 88, 4>}, {transform_indices = @transform_1, window_bounds = array<i64: 9, 4, 128>}, {transform_indices = @transform_2, window_bounds = array<i64: 1, 128>}, {transform_indices = @transform_3, window_bounds = array<i64: 1, 72, 128>}]} {
    %c0 = arith.constant 0 : index
    %c0_0 = arith.constant 0 : index
    %c0_1 = arith.constant 0 : index
    %c0_2 = arith.constant 0 : index
    %0 = vector.load %arg2[%c0, %c0_0, %c0_1, %c0_2] : memref<1x4x88x4xf32, #tpu.memory_space<vmem>>, vector<1x1x72x4xf32>
    %1 = vector.shape_cast %0 : vector<1x1x72x4xf32> to vector<72x4xf32>
    %c0_3 = arith.constant 0 : index
    %c0_4 = arith.constant 0 : index
    %c0_5 = arith.constant 0 : index
    %2 = vector.load %arg3[%c0_3, %c0_4, %c0_5] : memref<9x4x128xf32, #tpu.memory_space<vmem>>, vector<1x4x128xf32>
    %3 = vector.shape_cast %2 : vector<1x4x128xf32> to vector<4x128xf32>
    %cst = arith.constant dense<0.000000e+00> : vector<72x128xf32>
    %4 = tpu.matmul %1, %3, %cst {dimension_numbers = #tpu.dot_dimension_numbers<[1], [0], [0], [1], [0, 0, 1, 1], [], []>} : vector<72x4xf32>, vector<4x128xf32>, vector<72x128xf32> -> vector<72x128xf32>
    %c0_6 = arith.constant 0 : index
    %c1 = arith.constant 1 : index
    %c0_7 = arith.constant 0 : index
    %c0_8 = arith.constant 0 : index
    %5 = vector.load %arg2[%c0_6, %c1, %c0_7, %c0_8] : memref<1x4x88x4xf32, #tpu.memory_space<vmem>>, vector<1x1x72x4xf32>
    %6 = vector.shape_cast %5 : vector<1x1x72x4xf32> to vector<72x4xf32>
    %c1_9 = arith.constant 1 : index
    %c0_10 = arith.constant 0 : index
    %c0_11 = arith.constant 0 : index
    %7 = vector.load %arg3[%c1_9, %c0_10, %c0_11] : memref<9x4x128xf32, #tpu.memory_space<vmem>>, vector<1x4x128xf32>
    %8 = vector.shape_cast %7 : vector<1x4x128xf32> to vector<4x128xf32>
    %cst_12 = arith.constant dense<0.000000e+00> : vector<72x128xf32>
    %9 = tpu.matmul %6, %8, %cst_12 {dimension_numbers = #tpu.dot_dimension_numbers<[1], [0], [0], [1], [0, 0, 1, 1], [], []>} : vector<72x4xf32>, vector<4x128xf32>, vector<72x128xf32> -> vector<72x128xf32>
    %10 = arith.addf %4, %9 : vector<72x128xf32>
    %c0_13 = arith.constant 0 : index
    %c0_14 = arith.constant 0 : index
    %c1_15 = arith.constant 1 : index
    %c0_16 = arith.constant 0 : index
    %11 = vector.load %arg2[%c0_13, %c0_14, %c1_15, %c0_16] : memref<1x4x88x4xf32, #tpu.memory_space<vmem>>, vector<1x1x72x4xf32>
    %12 = vector.shape_cast %11 : vector<1x1x72x4xf32> to vector<72x4xf32>
    %c2 = arith.constant 2 : index
    %c0_17 = arith.constant 0 : index
    %c0_18 = arith.constant 0 : index
    %13 = vector.load %arg3[%c2, %c0_17, %c0_18] : memref<9x4x128xf32, #tpu.memory_space<vmem>>, vector<1x4x128xf32>
    %14 = vector.shape_cast %13 : vector<1x4x128xf32> to vector<4x128xf32>
    %cst_19 = arith.constant dense<0.000000e+00> : vector<72x128xf32>
    %15 = tpu.matmul %12, %14, %cst_19 {dimension_numbers = #tpu.dot_dimension_numbers<[1], [0], [0], [1], [0, 0, 1, 1], [], []>} : vector<72x4xf32>, vector<4x128xf32>, vector<72x128xf32> -> vector<72x128xf32>
    %16 = arith.addf %10, %15 : vector<72x128xf32>
    %c0_20 = arith.constant 0 : index
    %c2_21 = arith.constant 2 : index
    %c0_22 = arith.constant 0 : index
    %c0_23 = arith.constant 0 : index
    %17 = vector.load %arg2[%c0_20, %c2_21, %c0_22, %c0_23] : memref<1x4x88x4xf32, #tpu.memory_space<vmem>>, vector<1x1x72x4xf32>
    %18 = vector.shape_cast %17 : vector<1x1x72x4xf32> to vector<72x4xf32>
    %c3 = arith.constant 3 : index
    %c0_24 = arith.constant 0 : index
    %c0_25 = arith.constant 0 : index
    %19 = vector.load %arg3[%c3, %c0_24, %c0_25] : memref<9x4x128xf32, #tpu.memory_space<vmem>>, vector<1x4x128xf32>
    %20 = vector.shape_cast %19 : vector<1x4x128xf32> to vector<4x128xf32>
    %cst_26 = arith.constant dense<0.000000e+00> : vector<72x128xf32>
    %21 = tpu.matmul %18, %20, %cst_26 {dimension_numbers = #tpu.dot_dimension_numbers<[1], [0], [0], [1], [0, 0, 1, 1], [], []>} : vector<72x4xf32>, vector<4x128xf32>, vector<72x128xf32> -> vector<72x128xf32>
    %22 = arith.addf %16, %21 : vector<72x128xf32>
    %c0_27 = arith.constant 0 : index
    %c3_28 = arith.constant 3 : index
    %c0_29 = arith.constant 0 : index
    %c0_30 = arith.constant 0 : index
    %23 = vector.load %arg2[%c0_27, %c3_28, %c0_29, %c0_30] : memref<1x4x88x4xf32, #tpu.memory_space<vmem>>, vector<1x1x72x4xf32>
    %24 = vector.shape_cast %23 : vector<1x1x72x4xf32> to vector<72x4xf32>
    %c4 = arith.constant 4 : index
    %c0_31 = arith.constant 0 : index
    %c0_32 = arith.constant 0 : index
    %25 = vector.load %arg3[%c4, %c0_31, %c0_32] : memref<9x4x128xf32, #tpu.memory_space<vmem>>, vector<1x4x128xf32>
    %26 = vector.shape_cast %25 : vector<1x4x128xf32> to vector<4x128xf32>
    %cst_33 = arith.constant dense<0.000000e+00> : vector<72x128xf32>
    %27 = tpu.matmul %24, %26, %cst_33 {dimension_numbers = #tpu.dot_dimension_numbers<[1], [0], [0], [1], [0, 0, 1, 1], [], []>} : vector<72x4xf32>, vector<4x128xf32>, vector<72x128xf32> -> vector<72x128xf32>
    %28 = arith.addf %22, %27 : vector<72x128xf32>
    %c0_34 = arith.constant 0 : index
    %c2_35 = arith.constant 2 : index
    %c1_36 = arith.constant 1 : index
    %c0_37 = arith.constant 0 : index
    %29 = vector.load %arg2[%c0_34, %c2_35, %c1_36, %c0_37] : memref<1x4x88x4xf32, #tpu.memory_space<vmem>>, vector<1x1x72x4xf32>
    %30 = vector.shape_cast %29 : vector<1x1x72x4xf32> to vector<72x4xf32>
    %c5 = arith.constant 5 : index
    %c0_38 = arith.constant 0 : index
    %c0_39 = arith.constant 0 : index
    %31 = vector.load %arg3[%c5, %c0_38, %c0_39] : memref<9x4x128xf32, #tpu.memory_space<vmem>>, vector<1x4x128xf32>
    %32 = vector.shape_cast %31 : vector<1x4x128xf32> to vector<4x128xf32>
    %cst_40 = arith.constant dense<0.000000e+00> : vector<72x128xf32>
    %33 = tpu.matmul %30, %32, %cst_40 {dimension_numbers = #tpu.dot_dimension_numbers<[1], [0], [0], [1], [0, 0, 1, 1], [], []>} : vector<72x4xf32>, vector<4x128xf32>, vector<72x128xf32> -> vector<72x128xf32>
    %34 = arith.addf %28, %33 : vector<72x128xf32>
    %c0_41 = arith.constant 0 : index
    %c0_42 = arith.constant 0 : index
    %c9 = arith.constant 9 : index
    %c0_43 = arith.constant 0 : index
    %35 = vector.load %arg2[%c0_41, %c0_42, %c9, %c0_43] : memref<1x4x88x4xf32, #tpu.memory_space<vmem>>, vector<1x1x72x4xf32>
    %36 = vector.shape_cast %35 : vector<1x1x72x4xf32> to vector<72x4xf32>
    %c6 = arith.constant 6 : index
    %c0_44 = arith.constant 0 : index
    %c0_45 = arith.constant 0 : index
    %37 = vector.load %arg3[%c6, %c0_44, %c0_45] : memref<9x4x128xf32, #tpu.memory_space<vmem>>, vector<1x4x128xf32>
    %38 = vector.shape_cast %37 : vector<1x4x128xf32> to vector<4x128xf32>
    %cst_46 = arith.constant dense<0.000000e+00> : vector<72x128xf32>
    %39 = tpu.matmul %36, %38, %cst_46 {dimension_numbers = #tpu.dot_dimension_numbers<[1], [0], [0], [1], [0, 0, 1, 1], [], []>} : vector<72x4xf32>, vector<4x128xf32>, vector<72x128xf32> -> vector<72x128xf32>
    %40 = arith.addf %34, %39 : vector<72x128xf32>
    %c0_47 = arith.constant 0 : index
    %c1_48 = arith.constant 1 : index
    %c9_49 = arith.constant 9 : index
    %c0_50 = arith.constant 0 : index
    %41 = vector.load %arg2[%c0_47, %c1_48, %c9_49, %c0_50] : memref<1x4x88x4xf32, #tpu.memory_space<vmem>>, vector<1x1x72x4xf32>
    %42 = vector.shape_cast %41 : vector<1x1x72x4xf32> to vector<72x4xf32>
    %c7 = arith.constant 7 : index
    %c0_51 = arith.constant 0 : index
    %c0_52 = arith.constant 0 : index
    %43 = vector.load %arg3[%c7, %c0_51, %c0_52] : memref<9x4x128xf32, #tpu.memory_space<vmem>>, vector<1x4x128xf32>
    %44 = vector.shape_cast %43 : vector<1x4x128xf32> to vector<4x128xf32>
    %cst_53 = arith.constant dense<0.000000e+00> : vector<72x128xf32>
    %45 = tpu.matmul %42, %44, %cst_53 {dimension_numbers = #tpu.dot_dimension_numbers<[1], [0], [0], [1], [0, 0, 1, 1], [], []>} : vector<72x4xf32>, vector<4x128xf32>, vector<72x128xf32> -> vector<72x128xf32>
    %46 = arith.addf %40, %45 : vector<72x128xf32>
    %c0_54 = arith.constant 0 : index
    %c0_55 = arith.constant 0 : index
    %c10 = arith.constant 10 : index
    %c0_56 = arith.constant 0 : index
    %47 = vector.load %arg2[%c0_54, %c0_55, %c10, %c0_56] : memref<1x4x88x4xf32, #tpu.memory_space<vmem>>, vector<1x1x72x4xf32>
    %48 = vector.shape_cast %47 : vector<1x1x72x4xf32> to vector<72x4xf32>
    %c8 = arith.constant 8 : index
    %c0_57 = arith.constant 0 : index
    %c0_58 = arith.constant 0 : index
    %49 = vector.load %arg3[%c8, %c0_57, %c0_58] : memref<9x4x128xf32, #tpu.memory_space<vmem>>, vector<1x4x128xf32>
    %50 = vector.shape_cast %49 : vector<1x4x128xf32> to vector<4x128xf32>
    %cst_59 = arith.constant dense<0.000000e+00> : vector<72x128xf32>
    %51 = tpu.matmul %48, %50, %cst_59 {dimension_numbers = #tpu.dot_dimension_numbers<[1], [0], [0], [1], [0, 0, 1, 1], [], []>} : vector<72x4xf32>, vector<4x128xf32>, vector<72x128xf32> -> vector<72x128xf32>
    %52 = arith.addf %46, %51 : vector<72x128xf32>
    %c0_60 = arith.constant 0 : index
    %c0_61 = arith.constant 0 : index
    %53 = vector.load %arg4[%c0_60, %c0_61] : memref<1x128xf32, #tpu.memory_space<vmem>>, vector<1x128xf32>
    %54 = vector.broadcast %53 : vector<1x128xf32> to vector<72x128xf32>
    %55 = arith.addf %52, %54 : vector<72x128xf32>
    %cst_62 = arith.constant 0.000000e+00 : f32
    %56 = vector.broadcast %cst_62 : f32 to vector<72x128xf32>
    %57 = arith.cmpf oge, %55, %56 : vector<72x128xf32>
    %cst_63 = arith.constant 0.00999999977 : f32
    %58 = vector.broadcast %cst_63 : f32 to vector<72x128xf32>
    %59 = arith.mulf %58, %55 : vector<72x128xf32>
    %60 = arith.select %57, %55, %59 : vector<72x128xi1>, vector<72x128xf32>
    %c0_64 = arith.constant 0 : index
    %c0_65 = arith.constant 0 : index
    %c0_66 = arith.constant 0 : index
    %61 = vector.load %arg5[%c0_64, %c0_65, %c0_66] : memref<1x72x128xf32, #tpu.memory_space<vmem>>, vector<1x72x128xf32>
    %62 = vector.shape_cast %61 : vector<1x72x128xf32> to vector<72x128xf32>
    %63 = vector.shape_cast %60 : vector<72x128xf32> to vector<1x72x128xf32>
    tpu.vector_store %arg5[%c0_64, %c0_65, %c0_66], %63 {strides = array<i32>} : memref<1x72x128xf32, #tpu.memory_space<vmem>>, vector<1x72x128xf32>,
    return
  }
  func.func @transform_0(%arg0: i32, %arg1: i32) -> (i32, i32, i32, i32) {
    %c0_i32 = arith.constant 0 : i32
    %c0_i32_0 = arith.constant 0 : i32
    %c0_i32_1 = arith.constant 0 : i32
    %c0_i32_2 = arith.constant 0 : i32
    return %arg0, %c0_i32, %c0_i32_0, %c0_i32_1 : i32, i32, i32, i32
  }
  func.func @transform_1(%arg0: i32, %arg1: i32) -> (i32, i32, i32) {
    %c0_i32 = arith.constant 0 : i32
    %c0_i32_0 = arith.constant 0 : i32
    %c0_i32_1 = arith.constant 0 : i32
    return %c0_i32, %c0_i32_0, %arg1 : i32, i32, i32
  }
  func.func @transform_2(%arg0: i32, %arg1: i32) -> (i32, i32) {
    %c0_i32 = arith.constant 0 : i32
    %c0_i32_0 = arith.constant 0 : i32
    return %c0_i32, %arg1 : i32, i32
  }
  func.func @transform_3(%arg0: i32, %arg1: i32) -> (i32, i32, i32) {
    %c0_i32 = arith.constant 0 : i32
    %c0_i32_0 = arith.constant 0 : i32
    return %arg0, %c0_i32, %arg1 : i32, i32, i32
  }
}

</mosaic_0001>

<bundles_post_ra>
// kernel: tpu_custom_call.1
= control target key start
LH: loop header
LB: loop body
LE: loop exit
PB: predicated region body
PF: predicated region fallthrough
CT: control target
= control target key end

     0   :  { %8 = vsyncpa [#allocation3], 0  ;;  %s1921_s0 = inlined_call_operand.vmem [shape: f32[2,4,88,4], index: 0, kind: input, shape index: {}]   ;;  %s1922_s1 = inlined_call_operand.vmem [shape: f32[9,4,128], index: 1, kind: input, shape index: {}]   ;;  %s1923_s2 = inlined_call_operand.vmem [shape: f32[1,128], index: 2, kind: input, shape index: {}]   ;;  %s1924_s3 = inlined_call_operand.hbm [shape: f32[2,72,128], index: 3, kind: output, shape index: {}]  }
   0x1   :  { %10 = vsyncpa [#allocation3 + $0x1], 0  ;;  %s1531_s12 = smov 0   ;;  %s1533_s13 = smov 0  }
   0x2   :  { %s1535_s14 = smov 0   ;;  %s1537_s15 = smov 0  }
   0x3   :  { %s1539_s16 = smov 0   ;;  %s1541_s17 = smov 0  }
   0x4 LB: > { %s1211_s18 = sadd.s32 4294967295, %s1507_s17   ;;  %s1212_s19 = sadd.s32 4294967294, %s1507_s17   ;;  %s1507_s17 = sphi %s1541_s17, %s16_s17   ;;  %s1503_s16 = sphi %s1539_s16, %s1931_s16   ;;  %s1499_s15 = sphi %s1537_s15, %s1930_s15   ;;  %s1495_s14 = sphi %s1535_s14, %s1929_s14   ;;  %s1491_s13 = sphi %s1533_s13, %s1928_s13   ;;  %s1487_s12 = sphi %s1531_s12, %s1927_s12  }
   0x5   : > { %s28_s20 = sadd.s32 1, %s1503_s16  ;;  %s115_s21 = sadd.s32 1, %s1495_s14 }
   0x6   : > { %p30_p0 = scmp.ge.s32.totalorder %s28_s20, 2  ;;  %p125_p1 = scmp.ne.s32.totalorder %s1495_s14, %s1491_s13 }
   0x7   : > { %p126_p2 = scmp.eq.s32.totalorder %s1211_s18, 1  ;;  %p131_p3 = scmp.ne.s32.totalorder %s1491_s13, %s1487_s12 }
   0x8   : > { %s1933_s20 = smov (%p30_p0, %s28_s20), 0  ;;  %p132_p5 = scmp.eq.s32.totalorder %s1212_s19, 1 }
   0x9   : > { %p1571_p4 = por %p126_p2, %p125_p1  ;;  %s110_s23 = ssub.s32 %s1503_s16, %s1933_s20 }
   0xa   : > { %p1217_p6 = scmp.ge.s32.totalorder %s1507_s17, 1  ;;  %p113_p7 = scmp.eq.s32.totalorder %s110_s23, 0 }
   0xb   : > { %p1578_p8 = por %p132_p5, %p131_p3  ;;  %p171_p9 = scmp.lt.s32.totalorder %s1507_s17, 3 }
   0xc   : > { %s1584_s25 = scalar_select %p113_p7, %s1495_s14, %s115_s21  }
   0xd   : > { %p172_p10 = pnand %p1217_p6, %p171_p9 }
   0xe   : > { %p202_p11 = scmp.lt.s32.totalorder (!%p172_p10), %s1499_s15, 1  ;;  %s199_s5 = sand.u32 (!%p172_p10), 1, %s1491_s13  }
   0xf   : > { %175 = sbr.rel (%p172_p10) target bundleno = 333 (0x14d), region = 32  ;;  %s1449_s30 = scalar_lea.hbm (!%p172_p10), %s1924_s3, 144 }
  0x10   : > { %s1368_s8 = smul.u32 (!%p172_p10), 72, %s199_s5 }
  0x12   : > { %s1856_s9 = scalar_lea.vmem (!%p172_p10), [#allocation2], %s1368_s8 }
  0x13   : > { %s1109_s21 = sshll.u32 (!%p172_p10), %s1856_s9, 4  ;;  %s1110_s21 = int_to_ptr.vmem [resolvable:$true] %s1109_s21 }
  0x14   : > { %v1228_v0 = vld [vmem:[%s1922_s1 + $0x4] sm:$0xf]  ;;  %vm264_vm0 = vcmask 1043456   ;;  %v1249_v1 = vld [vmem:[%s1922_s1 + $0x8] sm:$0xf]  ;;  %s203_s7 = scalar_select %p202_p11, %s1499_s15, 1 }
  0x15   : > { %1365 = vmatpush.msk.msra.mxu1 %vm264_vm0, %v1228_v0  ;;  %1366 = vmatpush.msk.msra.mxu2 %vm264_vm0, %v1228_v0  ;;  %v223_v2 = vld [vmem:[%s1922_s1] sm:$0xf]  ;;  %v1269_v3 = vld [vmem:[%s1922_s1 + $0xc] sm:$0xf]  ;;  %v1289_v4 = vld [vmem:[%s1922_s1 + $0x10] sm:$0xf] }
  0x16   : > { %1367 = vmatpush.msk.msra.mxu3 %vm264_vm0, %v1228_v0  ;;  %1229 = vmatpush.msk.msra.mxu0 %vm264_vm0, %v1228_v0  ;;  %s1369_s10 = smul.u32 352, %s203_s7  ;;  %vm236_vm1 = vcmask 31744   ;;  %v1320_v5 = vld [vmem:[%s1922_s1 + $0x18] sm:$0xf]  ;;  %v1340_v6 = vld [vmem:[%s1922_s1 + $0x1c] sm:$0xf] }
  0x17   : > { %1250 = vmatpush.msk.msrb.mxu2 %vm264_vm0, %v1249_v1  ;;  %1239 = vmatpush.msk.msrb.mxu1 %vm264_vm0, %v223_v2  ;;  %v1309_v9 = vld [vmem:[%s1922_s1 + $0x14] sm:$0xf]  ;;  %v1351_v12 = vld [vmem:[%s1922_s1 + $0x20] sm:$0xf] }
  0x18   : > { %1270 = vmatpush.msk.msrb.mxu3 %vm264_vm0, %v1269_v3  ;;  %1290 = vmatpush.msk.msrb.mxu0 %vm264_vm0, %v1289_v4  ;;  %s1614_s19 = scalar_lea.vmem %s1921_s0, %s1369_s10  ;;  %s1370_s10 = smul.u32 72, %s1499_s15 }
  0x19   : > { %v1220_v7 = vld [vmem:[%s1614_s19 + $0x60] sm:$0xff]  ;;  %v1223_v8 = vld [vmem:[%s1614_s19 + $0x78] sm:$0xff]  ;;  %v1226_v10 = vld [vmem:[%s1614_s19 + $0x90] sm:$0xff]  ;;  %s1096_s15 = scalar_lea.sflag [#allocation3], %s199_s5 }
  0x1a   : > { %1231 = vmatmul.msk.f32.vlgmr.msra.gmra.mxu1 %vm236_vm1, %v1220_v7  ;;  %1234 = vmatmul.msk.f32.vlgmr.msra.gmra.mxu2 %vm236_vm1, %v1223_v8  ;;  %v1219_v11 = vld [vmem:[%s1614_s19 + $0x58] sm:$0xff]  ;;  %v1221_v13 = vld [vmem:[%s1614_s19 + $0x68] sm:$0xff]  ;;  %v1224_v14 = vld [vmem:[%s1614_s19 + $0x80] sm:$0xff] }
  0x1b   : > { %1237 = vmatmul.msk.f32.vlgmr.msra.gmra.mxu3 %vm236_vm1, %v1226_v10  ;;  %1321 = vmatpush.msk.msra.mxu2 %vm264_vm0, %v1320_v5  ;;  %v1227_v15 = vld [vmem:[%s1614_s19 + $0x98] sm:$0xff]  ;;  %v1280_v16 = vld [vmem:[%s1614_s19 + $0x108] sm:$0xff]  ;;  %v1222_v17 = vld [vmem:[%s1614_s19 + $0x70] sm:$0xff] }
  0x1c   : > { %1341 = vmatpush.msk.msra.mxu3 %vm264_vm0, %v1340_v6  ;;  %1310 = vmatpush.msk.msra.mxu1 %vm264_vm0, %v1309_v9  ;;  %v1225_v18 = vld [vmem:[%s1614_s19 + $0x88] sm:$0xff]  ;;  %v1260_v19 = vld [vmem:[%s1614_s19 + $0xb0] sm:$0xff]  ;;  %v214_v21 = vld [vmem:[%s1614_s19] sm:$0xff] }
  0x1d   : > { %1230 = vmatmul.msk.f32.vlgmr.msra.gmra.mxu0 %vm236_vm1, %v1219_v11  ;;  %v1281_v20 = vld [vmem:[%s1614_s19 + $0x110] sm:$0xff]  ;;  %v386_v22 = vld [vmem:[%s1614_s19 + $0x1] sm:$0xff]  ;;  %v1261_v23 = vld [vmem:[%s1614_s19 + $0xb8] sm:$0xff] }
  0x1e   : > { %1352 = vmatpush.msk.msra.mxu0 %vm264_vm0, %v1351_v12  ;;  %v1282_v24 = vld [vmem:[%s1614_s19 + $0x118] sm:$0xff]  ;;  %v215_v25 = vld [vmem:[%s1614_s19 + $0x8] sm:$0xff]  ;;  %v1262_v27 = vld [vmem:[%s1614_s19 + $0xc0] sm:$0xff] }
  0x1f   : > { %v1666_v26 = vld [vmem:[%s1614_s19 + $0x9] sm:$0xff]  ;;  %v1283_v28 = vld [vmem:[%s1614_s19 + $0x120] sm:$0xff]  ;;  %v1677_v30 = vld [vmem:[%s1614_s19 + $0x11] sm:$0xff] }
  0x20   : > { %v216_v29 = vld [vmem:[%s1614_s19 + $0x10] sm:$0xff]  ;;  %v1263_v31 = vld [vmem:[%s1614_s19 + $0xc8] sm:$0xff]  ;;  %v217_v33 = vld [vmem:[%s1614_s19 + $0x18] sm:$0xff] }
  0x21   : > { %v1284_v32 = vld [vmem:[%s1614_s19 + $0x128] sm:$0xff]  ;;  %v1688_v34 = vld [vmem:[%s1614_s19 + $0x19] sm:$0xff]  ;;  %v1264_v35 = vld [vmem:[%s1614_s19 + $0xd0] sm:$0xff] }
  0x22   : > { %1232 = vmatmul.msk.f32.gmra.mxu1 %vm236_vm1, %v1221_v13  ;;  %1235 = vmatmul.msk.f32.gmra.mxu2 %vm236_vm1, %v1224_v14  ;;  %v1285_v36 = vld [vmem:[%s1614_s19 + $0x130] sm:$0xff]  ;;  %v218_v37 = vld [vmem:[%s1614_s19 + $0x20] sm:$0xff]  ;;  %v1265_v39 = vld [vmem:[%s1614_s19 + $0xd8] sm:$0xff] }
  0x23   : > { %1238 = vmatmul.msk.f32.gmra.mxu3 %vm236_vm1, %v1227_v15  ;;  %v1699_v38 = vld [vmem:[%s1614_s19 + $0x21] sm:$0xff]  ;;  %v1286_v40 = vld [vmem:[%s1614_s19 + $0x138] sm:$0xff]  ;;  %v1710_v42 = vld [vmem:[%s1614_s19 + $0x29] sm:$0xff] }
  0x24   : > { %v219_v41 = vld [vmem:[%s1614_s19 + $0x28] sm:$0xff]  ;;  %v1266_v43 = vld [vmem:[%s1614_s19 + $0xe0] sm:$0xff]  ;;  %v220_v45 = vld [vmem:[%s1614_s19 + $0x30] sm:$0xff] }
  0x25   : > { %1291 = vmatmul.msk.f32.vlgmr.msrb.gmra.mxu0 %vm236_vm1, %v1280_v16  ;;  %v1287_v44 = vld [vmem:[%s1614_s19 + $0x140] sm:$0xff]  ;;  %v1721_v46 = vld [vmem:[%s1614_s19 + $0x31] sm:$0xff]  ;;  %v1267_v47 = vld [vmem:[%s1614_s19 + $0xe8] sm:$0xff] }
  0x26   : > { %v1288_v48 = vld [vmem:[%s1614_s19 + $0x148] sm:$0xff]  ;;  %v221_v49 = vld [vmem:[%s1614_s19 + $0x38] sm:$0xff]  ;;  %v1268_v51 = vld [vmem:[%s1614_s19 + $0xf0] sm:$0xff] }
  0x27   : > { %v1732_v50 = vld [vmem:[%s1614_s19 + $0x39] sm:$0xff]  ;;  %v952_v52 = vld [vmem:[%s1614_s19 + $0xa] sm:$0xff]  ;;  %v1743_v54 = vld [vmem:[%s1614_s19 + $0x41] sm:$0xff] }
  0x28   : > { %v222_v53 = vld [vmem:[%s1614_s19 + $0x40] sm:$0xff]  ;;  %v953_v56 = vld [vmem:[%s1614_s19 + $0x12] sm:$0xff]  ;;  %v1332_v58 = vld [vmem:[%s1614_s19 + $0x69] sm:$0xff] }
  0x29   : > { %v1331_v55 = vld [vmem:[%s1614_s19 + $0x61] sm:$0xff]  ;;  %v1300_v57 = vld [vmem:[%s1614_s19 + $0xb1] sm:$0xff]  ;;  %v1301_v60 = vld [vmem:[%s1614_s19 + $0xb9] sm:$0xff] }
  0x2a   : > { %1233 = vmatmul.msk.f32.gmra.mxu1 %vm236_vm1, %v1222_v17  ;;  %1236 = vmatmul.msk.f32.gmra.mxu2 %vm236_vm1, %v1225_v18  ;;  %v954_v59 = vld [vmem:[%s1614_s19 + $0x1a] sm:$0xff]  ;;  %v1333_v61 = vld [vmem:[%s1614_s19 + $0x71] sm:$0xff]  ;;  %v955_v62 = vld [vmem:[%s1614_s19 + $0x22] sm:$0xff] }
  0x2b   : > { %1271 = vmatmul.msk.f32.vlgmr.msrb.gmra.mxu3 %vm236_vm1, %v1260_v19  ;;  %v1302_v63 = vld [vmem:[%s1614_s19 + $0xc1] sm:$0xff]  ;;  %v1334_v0 = vld [vmem:[%s1614_s19 + $0x79] sm:$0xff]  ;;  %v956_v1 = vld [vmem:[%s1614_s19 + $0x2a] sm:$0xff] }
  0x2c   : > { %v1303_v2 = vld [vmem:[%s1614_s19 + $0xc9] sm:$0xff]  ;;  %v1335_v3 = vld [vmem:[%s1614_s19 + $0x81] sm:$0xff]  ;;  %v957_v4 = vld [vmem:[%s1614_s19 + $0x32] sm:$0xff] }
  0x2d   : > { %1292 = vmatmul.msk.f32.gmra.mxu0 %vm236_vm1, %v1281_v20  ;;  %v1304_v6 = vld [vmem:[%s1614_s19 + $0xd1] sm:$0xff]  ;;  %v1336_v7 = vld [vmem:[%s1614_s19 + $0x89] sm:$0xff]  ;;  %v958_v9 = vld [vmem:[%s1614_s19 + $0x3a] sm:$0xff] }
  0x2e   : > { %v1305_v13 = vld [vmem:[%s1614_s19 + $0xd9] sm:$0xff]  ;;  %v1337_v14 = vld [vmem:[%s1614_s19 + $0x91] sm:$0xff]  ;;  %v959_v16 = vld [vmem:[%s1614_s19 + $0x42] sm:$0xff] }
  0x2f   : > { %v1306_v20 = vld [vmem:[%s1614_s19 + $0xe1] sm:$0xff] }
  0x32   : > { %1240 = vmatmul.msk.f32.vlgmr.msrb.gmra.mxu1 %vm236_vm1, %v214_v21  ;;  %1251 = vmatmul.msk.f32.vlgmr.msrb.gmra.mxu2 %vm236_vm1, %v386_v22  ;;  %v1338_v21 = vld [vmem:[%s1614_s19 + $0x99] sm:$0xff] }
  0x33   : > { %1272 = vmatmul.msk.f32.gmra.mxu3 %vm236_vm1, %v1261_v23  ;;  %v960_v23 = vld [vmem:[%s1614_s19 + $0x4a] sm:$0xff] }
  0x35   : > { %1293 = vmatmul.msk.f32.gmra.mxu0 %vm236_vm1, %v1282_v24 }
  0x3a   : > { %1241 = vmatmul.msk.f32.gmra.mxu1 %vm236_vm1, %v215_v25  ;;  %1252 = vmatmul.msk.f32.gmra.mxu2 %vm236_vm1, %v1666_v26 }
  0x3b   : > { %1273 = vmatmul.msk.f32.gmra.mxu3 %vm236_vm1, %v1262_v27  ;;  %v1307_v27 = vld [vmem:[%s1614_s19 + $0xe9] sm:$0xff] }
  0x3d   : > { %1294 = vmatmul.msk.f32.gmra.mxu0 %vm236_vm1, %v1283_v28 }
  0x42   : > { %1242 = vmatmul.msk.f32.gmra.mxu1 %vm236_vm1, %v216_v29  ;;  %1253 = vmatmul.msk.f32.gmra.mxu2 %vm236_vm1, %v1677_v30  ;;  %v1339_v29 = vld [vmem:[%s1614_s19 + $0xa1] sm:$0xff] }
  0x43   : > { %1274 = vmatmul.msk.f32.gmra.mxu3 %vm236_vm1, %v1263_v31 }
  0x45   : > { %1295 = vmatmul.msk.f32.gmra.mxu0 %vm236_vm1, %v1284_v32 }
  0x4a   : > { %1243 = vmatmul.msk.f32.gmra.mxu1 %vm236_vm1, %v217_v33  ;;  %1254 = vmatmul.msk.f32.gmra.mxu2 %vm236_vm1, %v1688_v34 }
  0x4b   : > { %1275 = vmatmul.msk.f32.gmra.mxu3 %vm236_vm1, %v1264_v35  ;;  %v1308_v35 = vld [vmem:[%s1614_s19 + $0xf1] sm:$0xff] }
  0x4d   : > { %1296 = vmatmul.msk.f32.gmra.mxu0 %vm236_vm1, %v1285_v36  ;;  %v772_v36 = vld [vmem:[%s1614_s19 + $0x49] sm:$0xff]  ;;  %s1108_s19 = scalar_lea.hbm %s1924_s3, %s1370_s10 }
  0x4e   : > { %s1111_s23 = sshll.u32 %s1108_s19, 4  ;;  %s1112_s23 = int_to_ptr.hbm [resolvable:$true] %s1111_s23 }
  0x4f   : > { %s1443_s26 = sshra.s32 %s1112_s23, 4  ;;  %s1444_s26 = int_to_ptr.hbm [resolvable:$true] %s1443_s26 }
  0x50   : > { %s1445_s27 = scalar_lea.hbm %s1444_s26, 72  ;;  %p1450_p1 = scmp.lt.s32.totalorder %s1444_s26, %s1924_s3 }
  0x51   : > { %p1446_p12 = scmp.ne.s32.totalorder %s1444_s26, %s1445_s27  ;;  %p1451_p2 = scmp.lt.s32.totalorder %s1449_s30, %s1445_s27 }
  0x52   : > { %1244 = vmatmul.msk.f32.gmra.mxu1 %vm236_vm1, %v218_v37  ;;  %1255 = vmatmul.msk.f32.gmra.mxu2 %vm236_vm1, %v1699_v38 }
  0x53   : > { %1276 = vmatmul.msk.f32.gmra.mxu3 %vm236_vm1, %v1265_v39  ;;  %p1447_p13 = pnand %p1446_p12, %p1571_p4  ;;  %p1452_p3 = por %p1451_p2, %p1450_p1 }
  0x55   : > { %1297 = vmatmul.msk.f32.gmra.mxu0 %vm236_vm1, %v1286_v40  ;;  %p1448_p0 = pneg %p1447_p13 }
  0x57   : > { %p1453_p5 = pnand %p1452_p3, %p1448_p0 }
  0x5a   : > { %1245 = vmatmul.msk.f32.gmra.mxu1 %vm236_vm1, %v219_v41  ;;  %1256 = vmatmul.msk.f32.gmra.mxu2 %vm236_vm1, %v1710_v42 }
  0x5b   : > { %1277 = vmatmul.msk.f32.gmra.mxu3 %vm236_vm1, %v1266_v43 }
  0x5d   : > { %1298 = vmatmul.msk.f32.gmra.mxu0 %vm236_vm1, %v1287_v44 }
  0x62   : > { %1246 = vmatmul.msk.f32.gmra.mxu1 %vm236_vm1, %v220_v45  ;;  %1257 = vmatmul.msk.f32.gmra.mxu2 %vm236_vm1, %v1721_v46 }
  0x63   : > { %1278 = vmatmul.msk.f32.gmra.mxu3 %vm236_vm1, %v1267_v47 }
  0x65   : > { %1299 = vmatmul.msk.f32.gmra.mxu0 %vm236_vm1, %v1288_v48 }
  0x6a   : > { %1247 = vmatmul.msk.f32.gmra.mxu1 %vm236_vm1, %v221_v49  ;;  %1258 = vmatmul.msk.f32.gmra.mxu2 %vm236_vm1, %v1732_v50 }
  0x6b   : > { %1279 = vmatmul.msk.f32.gmra.mxu3 %vm236_vm1, %v1268_v51 }
  0x6d   : > { %1353 = vmatmul.msk.f32.vlgmr.msra.gmra.mxu0 %vm236_vm1, %v952_v52 }
  0x72   : > { %1248 = vmatmul.msk.f32.gmra.mxu1 %vm236_vm1, %v222_v53  ;;  %1259 = vmatmul.msk.f32.gmra.mxu2 %vm236_vm1, %v1743_v54 }
  0x73   : > { %1342 = vmatmul.msk.f32.vlgmr.msra.gmra.mxu3 %vm236_vm1, %v1331_v55 }
  0x75   : > { %1354 = vmatmul.msk.f32.gmra.mxu0 %vm236_vm1, %v953_v56 }
  0x7a   : > { %1311 = vmatmul.msk.f32.vlgmr.msra.gmra.mxu1 %vm236_vm1, %v1300_v57  ;;  %1322 = vmatmul.msk.f32.vlgmr.msra.gmra.mxu2 %vm236_vm1, %v1666_v26 }
  0x7b   : > { %1343 = vmatmul.msk.f32.gmra.mxu3 %vm236_vm1, %v1332_v58 }
  0x7d   : > { %1355 = vmatmul.msk.f32.gmra.mxu0 %vm236_vm1, %v954_v59 }
  0x82   : > { %1312 = vmatmul.msk.f32.gmra.mxu1 %vm236_vm1, %v1301_v60  ;;  %1323 = vmatmul.msk.f32.gmra.mxu2 %vm236_vm1, %v1677_v30 }
  0x83   : > { %1344 = vmatmul.msk.f32.gmra.mxu3 %vm236_vm1, %v1333_v61 }
  0x85   : > { %1356 = vmatmul.msk.f32.gmra.mxu0 %vm236_vm1, %v955_v62 }
  0x8a   : > { %1313 = vmatmul.msk.f32.gmra.mxu1 %vm236_vm1, %v1302_v63  ;;  %1324 = vmatmul.msk.f32.gmra.mxu2 %vm236_vm1, %v1688_v34 }
  0x8b   : > { %1345 = vmatmul.msk.f32.gmra.mxu3 %vm236_vm1, %v1334_v0 }
  0x8d   : > { %1357 = vmatmul.msk.f32.gmra.mxu0 %vm236_vm1, %v956_v1 }
  0x92   : > { %1314 = vmatmul.msk.f32.gmra.mxu1 %vm236_vm1, %v1303_v2  ;;  %1325 = vmatmul.msk.f32.gmra.mxu2 %vm236_vm1, %v1699_v38 }
  0x93   : > { %1346 = vmatmul.msk.f32.gmra.mxu3 %vm236_vm1, %v1335_v3 }
  0x95   : > { %1358 = vmatmul.msk.f32.gmra.mxu0 %vm236_vm1, %v957_v4 }
  0x97   : > { %v288_v5 = vpop.f32.mrf.mxu1 }
  0x9a   : > { %1315 = vmatmul.msk.f32.gmra.mxu1 %vm236_vm1, %v1304_v6  ;;  %1326 = vmatmul.msk.f32.gmra.mxu2 %vm236_vm1, %v1710_v42  ;;  %v285_v8 = vpop.f32.mrf.mxu0 }
  0x9b   : > { %1347 = vmatmul.msk.f32.gmra.mxu3 %vm236_vm1, %v1336_v7 }
  0x9d   : > { %v1791_v10 = vpop.f32.mrf.mxu2  ;;  %1359 = vmatmul.msk.f32.gmra.mxu0 %vm236_vm1, %v958_v9 }
  0x9e   : > { %v1794_v11 = vpop.f32.mrf.mxu3 }
  0x9f   : > { %v291_v12 = vpop.f32.mrf.mxu1 }
  0xa2   : > { %1316 = vmatmul.msk.f32.gmra.mxu1 %vm236_vm1, %v1305_v13  ;;  %1327 = vmatmul.msk.f32.gmra.mxu2 %vm236_vm1, %v1721_v46  ;;  %v634_v15 = vpop.f32.mrf.mxu0 }
  0xa3   : > { %1348 = vmatmul.msk.f32.gmra.mxu3 %vm236_vm1, %v1337_v14 }
  0xa5   : > { %v300_v17 = vpop.f32.mrf.mxu2  ;;  %1360 = vmatmul.msk.f32.gmra.mxu0 %vm236_vm1, %v959_v16 }
  0xa6   : > { %v1804_v18 = vpop.f32.mrf.mxu3 }
  0xa7   : > { %v294_v19 = vpop.f32.mrf.mxu1 }
  0xaa   : > { %1317 = vmatmul.msk.f32.gmra.mxu1 %vm236_vm1, %v1306_v20  ;;  %1328 = vmatmul.msk.f32.gmra.mxu2 %vm236_vm1, %v1732_v50  ;;  %v637_v22 = vpop.f32.mrf.mxu0 }
  0xab   : > { %1349 = vmatmul.msk.f32.gmra.mxu3 %vm236_vm1, %v1338_v21 }
  0xad   : > { %v303_v24 = vpop.f32.mrf.mxu2  ;;  %1361 = vmatmul.msk.f32.gmra.mxu0 %vm236_vm1, %v960_v23 }
  0xae   : > { %v539_v25 = vpop.f32.mrf.mxu3 }
  0xaf   : > { %v359_v26 = vpop.f32.mrf.mxu1 }
  0xb0   : > { %v360_v28 = vadd.f32 %v359_v26, %v285_v8 }
  0xb2   : > { %1318 = vmatmul.msk.f32.gmra.mxu1 %vm236_vm1, %v1307_v27  ;;  %1329 = vmatmul.msk.f32.gmra.mxu2 %vm236_vm1, %v1743_v54  ;;  %v640_v30 = vpop.f32.mrf.mxu0 }
  0xb3   : > { %1350 = vmatmul.msk.f32.gmra.mxu3 %vm236_vm1, %v1339_v29 }
  0xb5   : > { %v444_v31 = vpop.f32.mrf.mxu2 }
  0xb6   : > { %v471_v32 = vadd.f32 %v444_v31, %v360_v28  ;;  %v542_v33 = vpop.f32.mrf.mxu3 }
  0xb7   : > { %v362_v34 = vpop.f32.mrf.mxu1 }
  0xb8   : > { %v363_v37 = vadd.f32 %v362_v34, %v288_v5  ;;  %v566_v38 = vadd.f32 %v539_v25, %v471_v32 }
  0xba   : > { %v1822_v39 = vadd.f32 %v634_v15, %v566_v38  ;;  %1319 = vmatmul.msk.f32.gmra.mxu1 %vm236_vm1, %v1308_v35  ;;  %1330 = vmatmul.msk.f32.gmra.mxu2 %vm236_vm1, %v772_v36  ;;  %v643_v40 = vpop.f32.mrf.mxu0 }
  0xbd   : > { %v447_v41 = vpop.f32.mrf.mxu2 }
  0xbe   : > { %v472_v42 = vadd.f32 %v447_v41, %v363_v37  ;;  %v545_v43 = vpop.f32.mrf.mxu3 }
  0xbf   : > { %v365_v44 = vpop.f32.mrf.mxu1 }
  0xc0   : > { %v366_v45 = vadd.f32 %v365_v44, %v291_v12  ;;  %v567_v46 = vadd.f32 %v542_v33, %v472_v42 }
  0xc2   : > { %v1826_v47 = vadd.f32 %v637_v22, %v567_v46  ;;  %v646_v48 = vpop.f32.mrf.mxu0 }
  0xc5   : > { %v450_v49 = vpop.f32.mrf.mxu2 }
  0xc6   : > { %v473_v50 = vadd.f32 %v450_v49, %v366_v45  ;;  %v548_v51 = vpop.f32.mrf.mxu3 }
  0xc7   : > { %v368_v52 = vpop.f32.mrf.mxu1 }
  0xc8   : > { %v369_v53 = vadd.f32 %v368_v52, %v294_v19  ;;  %v568_v54 = vadd.f32 %v545_v43, %v473_v50 }
  0xca   : > { %v1828_v55 = vadd.f32 %v640_v30, %v568_v54  ;;  %v649_v56 = vpop.f32.mrf.mxu0 }
  0xcd   : > { %v453_v57 = vpop.f32.mrf.mxu2 }
  0xce   : > { %v474_v58 = vadd.f32 %v453_v57, %v369_v53  ;;  %v551_v59 = vpop.f32.mrf.mxu3 }
  0xcf   : > { %v371_v60 = vpop.f32.mrf.mxu1 }
  0xd0   : > { %v372_v61 = vadd.f32 %v371_v60, %v1791_v10  ;;  %v569_v62 = vadd.f32 %v548_v51, %v474_v58 }
  0xd2   : > { %v1831_v63 = vadd.f32 %v643_v40, %v569_v62  ;;  %v652_v0 = vpop.f32.mrf.mxu0 }
  0xd5   : > { %v456_v1 = vpop.f32.mrf.mxu2 }
  0xd6   : > { %v475_v2 = vadd.f32 %v456_v1, %v372_v61  ;;  %v554_v3 = vpop.f32.mrf.mxu3 }
  0xd7   : > { %v374_v4 = vpop.f32.mrf.mxu1 }
  0xd8   : > { %v375_v5 = vadd.f32 %v374_v4, %v300_v17  ;;  %v570_v6 = vadd.f32 %v551_v59, %v475_v2 }
  0xda   : > { %v1833_v7 = vadd.f32 %v646_v48, %v570_v6  ;;  %v655_v8 = vpop.f32.mrf.mxu0 }
  0xdd   : > { %v459_v9 = vpop.f32.mrf.mxu2 }
  0xde   : > { %v476_v12 = vadd.f32 %v459_v9, %v375_v5  ;;  %v557_v13 = vpop.f32.mrf.mxu3 }
  0xdf   : > { %v377_v14 = vpop.f32.mrf.mxu1 }
  0xe0   : > { %v378_v15 = vadd.f32 %v377_v14, %v303_v24  ;;  %v571_v16 = vadd.f32 %v554_v3, %v476_v12 }
  0xe2   : > { %v1835_v10 = vadd.f32 %v649_v56, %v571_v16  ;;  %v658_v20 = vpop.f32.mrf.mxu0 }
  0xe5   : > { %v462_v19 = vpop.f32.mrf.mxu2 }
  0xe6   : > { %v477_v21 = vadd.f32 %v462_v19, %v378_v15  ;;  %v560_v22 = vpop.f32.mrf.mxu3 }
  0xe7   : > { %v380_v23 = vpop.f32.mrf.mxu1 }
  0xe8   : > { %v572_v25 = vadd.f32 %v557_v13, %v477_v21  ;;  %v381_v17 = vadd.f32 %v380_v23, %v1794_v11 }
  0xea   : > { %v1837_v26 = vadd.f32 %v652_v0, %v572_v25  ;;  %v1010_v31 = vpop.f32.mrf.mxu0 }
  0xed   : > { %v465_v27 = vpop.f32.mrf.mxu2 }
  0xee   : > { %v478_v28 = vadd.f32 %v465_v27, %v381_v17  ;;  %v563_v29 = vpop.f32.mrf.mxu3 }
  0xef   : > { %v383_v30 = vpop.f32.mrf.mxu1 }
  0xf0   : > { %v573_v24 = vadd.f32 %v560_v22, %v478_v28  ;;  %v384_v33 = vadd.f32 %v383_v30, %v1804_v18  ;;  %v1850_v18 = vld [vmem:[%s1923_s2] ss:$0 sm:$0xff] }
  0xf2   : > { %v1840_v32 = vadd.f32 %v655_v8, %v573_v24  ;;  %v1013_v40 = vpop.f32.mrf.mxu0 }
  0xf5   : > { %v468_v34 = vpop.f32.mrf.mxu2 }
  0xf6   : > { %v479_v35 = vadd.f32 %v468_v34, %v384_v33  ;;  %v916_v36 = vpop.f32.mrf.mxu3 }
  0xf7   : > { %v728_v37 = vpop.f32.mrf.mxu1 }
  0xf8   : > { %v574_v38 = vadd.f32 %v563_v29, %v479_v35  ;;  %v755_v11 = vadd.f32 %v728_v37, %v1822_v39 }
  0xfa   : > { %v1843_v41 = vadd.f32 %v658_v20, %v574_v38  ;;  %v1016_v49 = vpop.f32.mrf.mxu0 }
  0xfd   : > { %v822_v42 = vpop.f32.mrf.mxu2 }
  0xfe   : > { %v849_v43 = vadd.f32 %v822_v42, %v755_v11  ;;  %v919_v44 = vpop.f32.mrf.mxu3 }
  0xff   : > { %v731_v45 = vpop.f32.mrf.mxu1 }
 0x100   : > { %v943_v46 = vadd.f32 %v916_v36, %v849_v43  ;;  %v756_v50 = vadd.f32 %v731_v45, %v1826_v47 }
 0x102   : > { %v1037_v48 = vadd.f32 %v1010_v31, %v943_v46  ;;  %v1019_v62 = vpop.f32.mrf.mxu0 }
 0x104   : > { %v1050_v51 = vadd.f32 %v1850_v18, %v1037_v48 }
 0x105   : > { %v825_v39 = vpop.f32.mrf.mxu2 }
 0x106   : > { %vm1059_vm2 = vcmp.ge.f32.partialorder %v1050_v51, 0.0  ;;  %v1068_v52 = vmul.f32 0.01, %v1050_v51  ;;  %v850_v53 = vadd.f32 %v825_v39, %v756_v50  ;;  %v922_v54 = vpop.f32.mrf.mxu3 }
 0x107   : > { %v734_v56 = vpop.f32.mrf.mxu1 }
 0x108   : > { %v1077_v57 = vsel %vm1059_vm2, %v1050_v51, %v1068_v52  ;;  %v944_v58 = vadd.f32 %v919_v44, %v850_v53  ;;  %v757_v60 = vadd.f32 %v734_v56, %v1828_v55 }
 0x109   : > { %1086 = vst [vmem:[%s1856_s9] sm:$0xff] %v1077_v57 }
 0x10a   : > { %v1038_v59 = vadd.f32 %v1013_v40, %v944_v58  ;;  %v1022_v16 = vpop.f32.mrf.mxu0 }
 0x10c   : > { %v1051_v47 = vadd.f32 %v1850_v18, %v1038_v59 }
 0x10d   : > { %v828_v61 = vpop.f32.mrf.mxu2 }
 0x10e   : > { %vm1060_vm3 = vcmp.ge.f32.partialorder %v1051_v47, 0.0  ;;  %v1069_v0 = vmul.f32 0.01, %v1051_v47  ;;  %v851_v1 = vadd.f32 %v828_v61, %v757_v60  ;;  %v925_v2 = vpop.f32.mrf.mxu3 }
 0x10f   : > { %v737_v3 = vpop.f32.mrf.mxu1 }
 0x110   : > { %v1078_v4 = vsel %vm1060_vm3, %v1051_v47, %v1069_v0  ;;  %v945_v5 = vadd.f32 %v922_v54, %v851_v1  ;;  %v758_v8 = vadd.f32 %v737_v3, %v1831_v63 }
 0x111   : > { %1087 = vst [vmem:[%s1856_s9 + $0x8] sm:$0xff] %v1078_v4 }
 0x112   : > { %v1039_v6 = vadd.f32 %v1016_v49, %v945_v5  ;;  %v1025_v31 = vpop.f32.mrf.mxu0 }
 0x114   : > { %v1052_v9 = vadd.f32 %v1850_v18, %v1039_v6 }
 0x115   : > { %v831_v12 = vpop.f32.mrf.mxu2 }
 0x116   : > { %vm1061_vm4 = vcmp.ge.f32.partialorder %v1052_v9, 0.0  ;;  %v1070_v55 = vmul.f32 0.01, %v1052_v9  ;;  %v852_v13 = vadd.f32 %v831_v12, %v758_v8  ;;  %v928_v14 = vpop.f32.mrf.mxu3 }
 0x117   : > { %v740_v15 = vpop.f32.mrf.mxu1 }
 0x118   : > { %v1079_v19 = vsel %vm1061_vm4, %v1052_v9, %v1070_v55  ;;  %v946_v20 = vadd.f32 %v925_v2, %v852_v13  ;;  %v759_v22 = vadd.f32 %v740_v15, %v1833_v7 }
 0x119   : > { %1088 = vst [vmem:[%s1856_s9 + $0x10] sm:$0xff] %v1079_v19 }
 0x11a   : > { %v1040_v21 = vadd.f32 %v1019_v62, %v946_v20  ;;  %v1028_v43 = vpop.f32.mrf.mxu0 }
 0x11c   : > { %v1053_v23 = vadd.f32 %v1850_v18, %v1040_v21 }
 0x11d   : > { %v834_v25 = vpop.f32.mrf.mxu2 }
 0x11e   : > { %vm1062_vm5 = vcmp.ge.f32.partialorder %v1053_v23, 0.0  ;;  %v1071_v63 = vmul.f32 0.01, %v1053_v23  ;;  %v853_v17 = vadd.f32 %v834_v25, %v759_v22  ;;  %v931_v28 = vpop.f32.mrf.mxu3 }
 0x11f   : > { %v743_v27 = vpop.f32.mrf.mxu1 }
 0x120   : > { %v1080_v29 = vsel %vm1062_vm5, %v1053_v23, %v1071_v63  ;;  %v947_v30 = vadd.f32 %v928_v14, %v853_v17  ;;  %v760_v33 = vadd.f32 %v743_v27, %v1835_v10 }
 0x121   : > { %1089 = vst [vmem:[%s1856_s9 + $0x18] sm:$0xff] %v1080_v29 }
 0x122   : > { %v1041_v24 = vadd.f32 %v1022_v16, %v947_v30 }
 0x124   : > { %v1054_v34 = vadd.f32 %v1850_v18, %v1041_v24 }
 0x125   : > { %v837_v35 = vpop.f32.mrf.mxu2 }
 0x126   : > { %vm1063_vm6 = vcmp.ge.f32.partialorder %v1054_v34, 0.0  ;;  %v1072_v7 = vmul.f32 0.01, %v1054_v34  ;;  %v854_v36 = vadd.f32 %v837_v35, %v760_v33  ;;  %v934_v11 = vpop.f32.mrf.mxu3 }
 0x127   : > { %v746_v37 = vpop.f32.mrf.mxu1 }
 0x128   : > { %v1081_v38 = vsel %vm1063_vm6, %v1054_v34, %v1072_v7  ;;  %v948_v40 = vadd.f32 %v931_v28, %v854_v36  ;;  %v761_v44 = vadd.f32 %v746_v37, %v1837_v26  ;;  %v1031_v26 = vpop.f32.mrf.mxu0 }
 0x129   : > { %1090 = vst [vmem:[%s1856_s9 + $0x20] sm:$0xff] %v1081_v38 }
 0x12a   : > { %v1042_v42 = vadd.f32 %v1025_v31, %v948_v40 }
 0x12c   : > { %v1055_v45 = vadd.f32 %v1850_v18, %v1042_v42 }
 0x12d   : > { %v840_v46 = vpop.f32.mrf.mxu2 }
 0x12e   : > { %vm1064_vm7 = vcmp.ge.f32.partialorder %v1055_v45, 0.0  ;;  %v1073_v10 = vmul.f32 0.01, %v1055_v45  ;;  %v855_v48 = vadd.f32 %v840_v46, %v761_v44  ;;  %v937_v52 = vpop.f32.mrf.mxu3 }
 0x12f   : > { %v749_v49 = vpop.f32.mrf.mxu1 }
 0x130   : > { %v1082_v50 = vsel %vm1064_vm7, %v1055_v45, %v1073_v10  ;;  %v949_v51 = vadd.f32 %v934_v11, %v855_v48  ;;  %v762_v53 = vadd.f32 %v749_v49, %v1840_v32  ;;  %v1034_v4 = vpop.f32.mrf.mxu0 }
 0x131   : > { %1091 = vst [vmem:[%s1856_s9 + $0x28] sm:$0xff] %v1082_v50 }
 0x132   : > { %v1043_v39 = vadd.f32 %v1028_v43, %v949_v51 }
 0x134   : > { %v1056_v54 = vadd.f32 %v1850_v18, %v1043_v39 }
 0x135   : > { %v843_v56 = vpop.f32.mrf.mxu2 }
 0x136   : > { %vm1065_vm8 = vcmp.ge.f32.partialorder %v1056_v54, 0.0  ;;  %v1074_v57 = vmul.f32 0.01, %v1056_v54  ;;  %v856_v58 = vadd.f32 %v843_v56, %v762_v53  ;;  %v940_v1 = vpop.f32.mrf.mxu3 }
 0x137   : > { %v752_v47 = vpop.f32.mrf.mxu1 }
 0x138   : > { %v1083_v59 = vsel %vm1065_vm8, %v1056_v54, %v1074_v57  ;;  %v950_v60 = vadd.f32 %v937_v52, %v856_v58  ;;  %v763_v62 = vadd.f32 %v752_v47, %v1843_v41 }
 0x139   : > { %1092 = vst [vmem:[%s1856_s9 + $0x30] sm:$0xff] %v1083_v59 }
 0x13a   : > { %v1044_v61 = vadd.f32 %v1031_v26, %v950_v60 }
 0x13c   : > { %v1057_v0 = vadd.f32 %v1850_v18, %v1044_v61 }
 0x13d   : > { %v846_v32 = vpop.f32.mrf.mxu2 }
 0x13e   : > { %vm1066_vm9 = vcmp.ge.f32.partialorder %v1057_v0, 0.0  ;;  %v1075_v2 = vmul.f32 0.01, %v1057_v0  ;;  %v857_v3 = vadd.f32 %v846_v32, %v763_v62 }
 0x140   : > { %v1084_v5 = vsel %vm1066_vm9, %v1057_v0, %v1075_v2  ;;  %v951_v6 = vadd.f32 %v940_v1, %v857_v3 }
 0x141   : > { %1093 = vst [vmem:[%s1856_s9 + $0x38] sm:$0xff] %v1084_v5 }
 0x142   : > { %v1045_v41 = vadd.f32 %v1034_v4, %v951_v6 }
 0x144   : > { %v1058_v8 = vadd.f32 %v1850_v18, %v1045_v41 }
 0x146   : > { %vm1067_vm10 = vcmp.ge.f32.partialorder %v1058_v8, 0.0  ;;  %v1076_v9 = vmul.f32 0.01, %v1058_v8 }
 0x148   : > { %v1085_v12 = vsel %vm1067_vm10, %v1058_v8, %v1076_v9 }
 0x149   : > { %1094 = vst [vmem:[%s1856_s9 + $0x40] sm:$0xff] %v1085_v12 }
 0x14a   : > { %1456 = shalt.err (!%p1453_p5)
}
 0x14b   : > { %s1509_s5 = smov 128   ;;  %s1510_s7 = smov 8  }
 0x14c   : > { %1371 = dma.vmem_to_hbm [thread:$0]  (%p1571_p4), %s1110_s21, 1152, %s1112_s23, %s1096_s15, %s1509_s5, %s1509_s5, %s1510_s7  }
 0x14d PF: > { %p1377_p6 = scmp.ge.s32.totalorder %s1507_s17, 2  ;;  %s1126_s8 = sand.u32 1, %s1487_s12  }
 0x14e   : > { %s1127_s9 = scalar_lea.sflag [#allocation3], %s1126_s8 }
 0x14f   : > { %p1374_p7 = pnand %p1377_p6, %p1578_p8 }
 0x151   : > { %p1375_p9 = pneg %p1374_p7 }
 0x153   : > { %1482 = dma.done.wait (%p1375_p9), %s1127_s9, 1152  }
 0x154   : > { %1484 = vsyncadd (%p1375_p9), %s1127_s9, 4294966144  ;;  %s16_s17 = sadd.s32 1, %s1507_s17   ;;  %s1927_s12 = smov %s1491_s13 }
 0x155   : > { %p13_p10 = scmp.ge.s32.totalorder %s16_s17, 4   ;;  %s1928_s13 = smov %s1495_s14 }
 0x156   : > { %s1929_s14 = smov %s1584_s25  ;;  %s1930_s15 = smov %s1503_s16 }
 0x157   : > { %s1931_s16 = smov %s1933_s20  ;;  %15 = sbr.rel (!%p13_p10) target bundleno = 4 (0x4), region = 84 }
 0x15c   :  { %1133 = vsyncpa [#allocation3], 1 }
 0x15d   :  { %1135 = vsyncpa [#allocation3 + $0x1], 1 }

</bundles_post_ra>
